<compile_context>
chip_gen: v5e
topology: v5e:2x2
jax: 0.10.0
libtpu: 0.0.40
codegen_flags: <defaults>
</compile_context>

<pallas_src>
import numpy as np
import jax
import jax.numpy as jnp
from jax.experimental import pallas as pl
from jax.experimental.pallas import tpu as pltpu

# ----------------------------- problem sizes --------------------------------
BATCH = 8          # samples per loader batch
IN_F = 32          # input feature dim
HIDDEN = 64        # hidden dim of the classifier MLP
N_CLASSES = 8      # number of classes (CrossEntropyLoss / argmax accuracy)

# Row-chunk sizing.  TM_MAX amortizes the per-grid-step overhead (tile sweeps
# show 256->512->1024 ~= 63%->85%->86% of HBM roofline); TM_ALIGN keeps the
# bf16 x block sublane-aligned (16 packed rows) and is a multiple of BATCH so
# loader batches never straddle a chunk boundary.
TM_MAX = 2048
TM_ALIGN = 16
assert TM_MAX % TM_ALIGN == 0 and TM_ALIGN % BATCH == 0


def _round_up(v, m):
    return ((v + m - 1) // m) * m


# ------------------------------- the kernel ---------------------------------
def fused_mlp_ce_kernel(x_ref, w1_ref, b1_ref, w2_ref, b2_ref, y_ref, selT_ref,
                        out_ref):
    """One TM-row chunk of stacked samples.

    logits = relu(x@W1+b1)@W2+b2 (bf16 MXU operands, f32 accumulation),
    per-sample CE nll + argmax correctness (f32), then per-loader-batch sums
    via ONE standard-orientation MXU contraction with the resident selector:
        sums[b, 0] = sum_r selT[b, r] * nll[r]
        sums[b, 1] = sum_r selT[b, r] * correct[r]
    Padded rows carry y = -1 and contribute exactly 0.
    """
    x = x_ref[...]                                              # [TM, IN_F] bf16

    # --- MLP forward: bf16 MXU operands, f32 accumulation; element-wise f32 ---
    h = jnp.dot(x, w1_ref[...], preferred_element_type=jnp.float32) + b1_ref[...]
    h = jnp.maximum(h, 0.0)                                     # ReLU (f32)
    logits = (jnp.dot(h.astype(jnp.bfloat16), w2_ref[...],
                      preferred_element_type=jnp.float32)
              + b2_ref[...])                                    # [TM, C] f32

    tm, C = logits.shape
    y = y_ref[...]                                              # [TM, 1] int32

    # --- CrossEntropy per-sample nll (max-stabilized log-softmax, f32) ---
    m = jnp.max(logits, axis=-1, keepdims=True)                 # [TM, 1]
    z = logits - m
    lse = jnp.log(jnp.sum(jnp.exp(z), axis=-1, keepdims=True))  # [TM, 1]
    logp = z - lse                                              # [TM, C]
    class_ids = jax.lax.broadcasted_iota(jnp.int32, (tm, C), 1)
    onehot = (class_ids == y).astype(jnp.float32)               # 0 rows for y=-1
    nll = -jnp.sum(onehot * logp, axis=-1, keepdims=True)       # [TM, 1]

    # --- accuracy: argmax with torch tie-break (min index attaining the max) ---
    pred = jnp.min(jnp.where(logits == m, class_ids, C),
                   axis=-1, keepdims=True)                      # [TM, 1]
    correct = (pred == y).astype(jnp.float32)                   # [TM, 1]

    # --- per-loader-batch partial sums on the (otherwise idle) MXU ---
    col2 = jax.lax.broadcasted_iota(jnp.int32, (tm, 2), 1)
    metrics = jnp.where(col2 == 0, nll, correct)                # [TM, 2] f32
    sums = jnp.dot(selT_ref[...], metrics,
                   preferred_element_type=jnp.float32)          # [NBP, 2] f32
    out_ref[...] = sums.reshape(1, *sums.shape)


# ------------------------- fused whole-loader forward ------------------------
def _fused_forward_metrics(x_all, y_all, w1, b1, w2, b2):
    """Forward + CE + accuracy for ALL stacked samples in one pallas_call.

    Returns (per_batch_loss [n_batches], per_batch_acc [n_batches])."""
    n_rows = x_all.shape[0]
    n_batches = n_rows // BATCH

    # Largest chunk that (a) amortizes per-step overhead and (b) still leaves
    # >= 2 grid steps for small inputs so v7x's two TensorCores both get work.
    tm = min(TM_MAX, max(TM_ALIGN, _round_up(pl.cdiv(n_rows, 2), TM_ALIGN)))
    n_chunks = pl.cdiv(n_rows, tm)
    nb_per_chunk = tm // BATCH
    nbp = _round_up(nb_per_chunk, 8)          # sublane-aligned per-batch slots

    pad = n_chunks * tm - n_rows
    # bf16 MXU inputs: halves the streamed x HBM->VMEM traffic and removes the
    # per-step VPU casts; accumulation and all element-wise math stay f32.
    x_pad = jnp.pad(x_all, ((0, pad), (0, 0))).astype(jnp.bfloat16)
    y_pad = jnp.pad(y_all, ((0, pad), (0, 0)), constant_values=-1)
    w1b = w1.astype(jnp.bfloat16)
    w2b = w2.astype(jnp.bfloat16)

    # Loop-invariant batch-selector matrix (selT[b, r] = 1 iff row r belongs to
    # loader batch b), hoisted out of the kernel and held VMEM-resident so no
    # per-grid-step iota/compare/cast filler hits the VPU.
    selT = (jnp.arange(nbp, dtype=jnp.int32)[:, None]
            == jnp.arange(tm, dtype=jnp.int32)[None, :] // BATCH
            ).astype(jnp.float32)                               # [nbp, tm]

    out = pl.pallas_call(
        fused_mlp_ce_kernel,
        out_shape=jax.ShapeDtypeStruct((n_chunks, nbp, 2), jnp.float32),
        grid_spec=pltpu.PrefetchScalarGridSpec(
            num_scalar_prefetch=0,
            grid=(n_chunks,),
            in_specs=[
                # x chunk is the only per-step streamed input.
                # TODO(synk): add pipeline_mode=pl.Buffered(3) here iff
                #             profiling still shows exposed x DMA after the
                #             larger-TM change.
                pl.BlockSpec((tm, IN_F), lambda i: (i, 0)),
                pl.BlockSpec((IN_F, HIDDEN), lambda i: (0, 0)),       # W1 resident
                pl.BlockSpec((1, HIDDEN), lambda i: (0, 0)),          # b1 resident
                pl.BlockSpec((HIDDEN, N_CLASSES), lambda i: (0, 0)),  # W2 resident
                pl.BlockSpec((1, N_CLASSES), lambda i: (0, 0)),       # b2 resident
                pl.BlockSpec((tm, 1), lambda i: (i, 0)),              # y chunk
                pl.BlockSpec((nbp, tm), lambda i: (0, 0)),            # selT resident
            ],
            out_specs=pl.BlockSpec((1, nbp, 2), lambda i: (i, 0, 0)),
        ),
        compiler_params=pltpu.CompilerParams(
            dimension_semantics=("parallel",)),   # shards chunks on v7x's 2 TCs
    )(x_pad, w1b, b1, w2b, b2, y_pad, selT)

    # unpack per-batch sums (tiny on-device XLA ops; no host sync here)
    loss_sums = out[:, :nb_per_chunk, 0].reshape(-1)[:n_batches]
    corr_sums = out[:, :nb_per_chunk, 1].reshape(-1)[:n_batches]
    # CE / accuracy are means over the (fixed-size) loader batch.
    per_batch_loss = loss_sums * (1.0 / BATCH)
    per_batch_acc = corr_sums * (1.0 / BATCH)
    return per_batch_loss, per_batch_acc


fused_forward_metrics = jax.jit(_fused_forward_metrics)


def _stack_loader(loader):
    xs = jnp.concatenate([x for x, _ in loader], axis=0)
    ys = jnp.concatenate([y for _, y in loader], axis=0)
    return xs, ys


# -------------------- Trainer.forward bookkeeping (glue) --------------------
def trainer_forward(epochs, train_loader, validation_loader, params):
    loss_history = {'train': [], 'validation': [], 'val_accuracy': []}
    n_tr_batches = len(train_loader)
    print_every = n_tr_batches // 10       # same expression as the PyTorch code
    if not isinstance(epochs, range):
        epochs = range(epochs)

    w1, b1, w2, b2 = params
    x_tr, y_tr = _stack_loader(train_loader)
    x_va, y_va = _stack_loader(validation_loader)

    # Fuse the "training" forward pass and the validation pass into ONE launch
    # by concatenating the stacked loaders.  Parameters never change (no
    # backward pass is emulated), so the per-epoch results are identical and
    # the launch is hoisted out of the epoch loop entirely.
    # TODO(synk): loss.backward()/optimizer.step()/scheduler.step() and the
    #             TensorBoard SummaryWriter have no forward-pass Pallas
    #             equivalent and are intentionally not emulated.
    x_all = jnp.concatenate([x_tr, x_va], axis=0)
    y_all = jnp.concatenate([y_tr, y_va], axis=0)
    loss_b, acc_b = fused_forward_metrics(x_all, y_all, w1, b1, w2, b2)

    # single device -> host sync for the whole run
    loss_np, acc_np = jax.device_get((loss_b, acc_b))
    tr_loss_np = loss_np[:n_tr_batches]
    va_loss_np = loss_np[n_tr_batches:]
    va_acc_np = acc_np[n_tr_batches:]

    for _epoch in epochs:
        if print_every > 0:                # guard the //10 == 0 ZeroDivision case
            for i in range(n_tr_batches):
                if (i + 1) % print_every == 0:
                    loss_history['train'].append(float(tr_loss_np[i]))
        loss_history['validation'].append(float(np.mean(va_loss_np)))
        loss_history['val_accuracy'].append(float(np.mean(va_acc_np)))

    return loss_history


# ---------------------------------- main -------------------------------------
if __name__ == "__main__":
    key = jax.random.PRNGKey(0)
    k_w1, k_w2 = jax.random.split(key, 2)

    # deterministic parameter init (shapes implied by the classifier forward)
    w1 = (jax.random.normal(k_w1, (IN_F, HIDDEN), jnp.float32)
          * (1.0 / np.sqrt(IN_F)))
    b1 = jnp.zeros((1, HIDDEN), jnp.float32)
    w2 = (jax.random.normal(k_w2, (HIDDEN, N_CLASSES), jnp.float32)
          * (1.0 / np.sqrt(HIDDEN)))
    b2 = jnp.zeros((1, N_CLASSES), jnp.float32)
    params = (w1, b1, w2, b2)

    # synthetic "DataLoaders": lists of (x, y) batches
    def make_loader(seed, n_batches):
        loader = []
        k = jax.random.PRNGKey(seed)
        for _ in range(n_batches):
            k, kx, ky = jax.random.split(k, 3)
            x = jax.random.normal(kx, (BATCH, IN_F), jnp.float32)
            y = jax.random.randint(ky, (BATCH, 1), 0, N_CLASSES, jnp.int32)
            loader.append((x, y))
        return loader

    train_loader = make_loader(1, 10)        # 10 batches so print_every == 1
    validation_loader = make_loader(2, 4)

    # run the fused kernel once over the stacked validation loader and block
    x_va, y_va = _stack_loader(validation_loader)
    va_loss_b, va_acc_b = jax.block_until_ready(
        fused_forward_metrics(x_va, y_va, w1, b1, w2, b2))
    assert va_loss_b.shape == (len(validation_loader),)
    assert va_acc_b.shape == (len(validation_loader),)
    assert bool(jnp.all(jnp.isfinite(va_loss_b)))
    assert bool(jnp.all((va_acc_b >= 0.0) & (va_acc_b <= 1.0)))

    # full Trainer.forward emulation for 1 epoch (single fused launch)
    history = trainer_forward(1, train_loader, validation_loader, params)
    assert len(history['train']) == 10
    assert len(history['validation']) == 1
    assert len(history['val_accuracy']) == 1
    assert np.isfinite(history['validation'][0])

    print("KERNEL_OK")
</pallas_src>

<mosaic_0001>
module attributes {stable_mosaic.version = 11 : i64} {
  func.func @fused_mlp_ce_kernel(%arg0: i32, %arg1: memref<16x32xbf16, #tpu.memory_space<vmem>>, %arg2: memref<32x64xbf16, #tpu.memory_space<vmem>>, %arg3: memref<1x64xf32, #tpu.memory_space<vmem>>, %arg4: memref<64x8xbf16, #tpu.memory_space<vmem>>, %arg5: memref<1x8xf32, #tpu.memory_space<vmem>>, %arg6: memref<16x1xi32, #tpu.memory_space<vmem>>, %arg7: memref<8x16xf32, #tpu.memory_space<vmem>>, %arg8: memref<1x8x2xf32, #tpu.memory_space<vmem>>) attributes {dimension_semantics = [#tpu.dimension_semantics<parallel>], iteration_bounds = array<i64: 2>, scalar_prefetch = 0 : i64, scratch_operands = 0 : i64, tpu.core_type = #tpu.core_type<tc>, window_params = [{transform_indices = @transform_0, window_bounds = array<i64: 16, 32>}, {pipeline_mode = #tpu.pipeline_mode<synchronous>, transform_indices = @transform_1, window_bounds = array<i64: 32, 64>}, {pipeline_mode = #tpu.pipeline_mode<synchronous>, transform_indices = @transform_2, window_bounds = array<i64: 1, 64>}, {pipeline_mode = #tpu.pipeline_mode<synchronous>, transform_indices = @transform_3, window_bounds = array<i64: 64, 8>}, {pipeline_mode = #tpu.pipeline_mode<synchronous>, transform_indices = @transform_4, window_bounds = array<i64: 1, 8>}, {transform_indices = @transform_5, window_bounds = array<i64: 16, 1>}, {pipeline_mode = #tpu.pipeline_mode<synchronous>, transform_indices = @transform_6, window_bounds = array<i64: 8, 16>}, {transform_indices = @transform_7, window_bounds = array<i64: 1, 8, 2>}]} {
    %c0 = arith.constant 0 : index
    %c0_0 = arith.constant 0 : index
    %0 = vector.load %arg1[%c0, %c0_0] : memref<16x32xbf16, #tpu.memory_space<vmem>>, vector<16x32xbf16>
    %c0_1 = arith.constant 0 : index
    %c0_2 = arith.constant 0 : index
    %1 = vector.load %arg2[%c0_1, %c0_2] : memref<32x64xbf16, #tpu.memory_space<vmem>>, vector<32x64xbf16>
    %cst = arith.constant dense<0.000000e+00> : vector<16x64xf32>
    %2 = tpu.matmul %0, %1, %cst {dimension_numbers = #tpu.dot_dimension_numbers<[1], [0], [0], [1], [0, 0, 1, 1], [], []>} : vector<16x32xbf16>, vector<32x64xbf16>, vector<16x64xf32> -> vector<16x64xf32>
    %c0_3 = arith.constant 0 : index
    %c0_4 = arith.constant 0 : index
    %3 = vector.load %arg3[%c0_3, %c0_4] : memref<1x64xf32, #tpu.memory_space<vmem>>, vector<1x64xf32>
    %4 = vector.broadcast %3 : vector<1x64xf32> to vector<16x64xf32>
    %5 = arith.addf %2, %4 : vector<16x64xf32>
    %cst_5 = arith.constant 0.000000e+00 : f32
    %6 = vector.broadcast %cst_5 : f32 to vector<16x64xf32>
    %7 = arith.maximumf %5, %6 : vector<16x64xf32>
    %8 = arith.truncf %7 : vector<16x64xf32> to vector<16x64xbf16>
    %c0_6 = arith.constant 0 : index
    %c0_7 = arith.constant 0 : index
    %9 = vector.load %arg4[%c0_6, %c0_7] : memref<64x8xbf16, #tpu.memory_space<vmem>>, vector<64x8xbf16>
    %cst_8 = arith.constant dense<0.000000e+00> : vector<16x8xf32>
    %10 = tpu.matmul %8, %9, %cst_8 {dimension_numbers = #tpu.dot_dimension_numbers<[1], [0], [0], [1], [0, 0, 1, 1], [], []>} : vector<16x64xbf16>, vector<64x8xbf16>, vector<16x8xf32> -> vector<16x8xf32>
    %c0_9 = arith.constant 0 : index
    %c0_10 = arith.constant 0 : index
    %11 = vector.load %arg5[%c0_9, %c0_10] : memref<1x8xf32, #tpu.memory_space<vmem>>, vector<1x8xf32>
    %12 = vector.broadcast %11 : vector<1x8xf32> to vector<16x8xf32>
    %13 = arith.addf %10, %12 : vector<16x8xf32>
    %c0_11 = arith.constant 0 : index
    %c0_12 = arith.constant 0 : index
    %14 = vector.load %arg6[%c0_11, %c0_12] : memref<16x1xi32, #tpu.memory_space<vmem>>, vector<16x1xi32>
    %cst_13 = arith.constant dense<0xFF800000> : vector<16xf32>
    %15 = vector.multi_reduction <maximumf>, %13, %cst_13 [1] : vector<16x8xf32> to vector<16xf32>
    %16 = vector.shape_cast %15 : vector<16xf32> to vector<16x1xf32>
    %17 = vector.broadcast %16 : vector<16x1xf32> to vector<16x8xf32>
    %18 = arith.subf %13, %17 : vector<16x8xf32>
    %19 = math.exp %18 : vector<16x8xf32>
    %cst_14 = arith.constant dense<0.000000e+00> : vector<16xf32>
    %20 = vector.multi_reduction <add>, %19, %cst_14 [1] : vector<16x8xf32> to vector<16xf32>
    %21 = vector.shape_cast %20 : vector<16xf32> to vector<16x1xf32>
    %22 = math.log %21 : vector<16x1xf32>
    %23 = vector.broadcast %22 : vector<16x1xf32> to vector<16x8xf32>
    %24 = arith.subf %18, %23 : vector<16x8xf32>
    %25 = tpu.iota {dimensions = array<i32: 1>} : vector<16x8xi32>
    %26 = vector.broadcast %14 : vector<16x1xi32> to vector<16x8xi32>
    %27 = arith.cmpi eq, %25, %26 : vector<16x8xi32>
    %28 = arith.extui %27 : vector<16x8xi1> to vector<16x8xi32>
    %29 = arith.sitofp %28 : vector<16x8xi32> to vector<16x8xf32>
    %30 = arith.mulf %29, %24 : vector<16x8xf32>
    %cst_15 = arith.constant dense<0.000000e+00> : vector<16xf32>
    %31 = vector.multi_reduction <add>, %30, %cst_15 [1] : vector<16x8xf32> to vector<16xf32>
    %32 = vector.shape_cast %31 : vector<16xf32> to vector<16x1xf32>
    %cst_16 = arith.constant 0.000000e+00 : f32
    %33 = vector.broadcast %cst_16 : f32 to vector<16x1xf32>
    %34 = arith.subf %33, %32 : vector<16x1xf32>
    %35 = vector.broadcast %16 : vector<16x1xf32> to vector<16x8xf32>
    %36 = arith.cmpf oeq, %13, %35 : vector<16x8xf32>
    %c8_i32 = arith.constant 8 : i32
    %37 = vector.broadcast %c8_i32 : i32 to vector<16x8xi32>
    %38 = arith.select %36, %25, %37 : vector<16x8xi1>, vector<16x8xi32>
    %cst_17 = arith.constant dense<2147483647> : vector<16xi32>
    %39 = vector.multi_reduction <minsi>, %38, %cst_17 [1] : vector<16x8xi32> to vector<16xi32>
    %40 = vector.shape_cast %39 : vector<16xi32> to vector<16x1xi32>
    %41 = arith.cmpi eq, %40, %14 : vector<16x1xi32>
    %42 = arith.extui %41 : vector<16x1xi1> to vector<16x1xi32>
    %43 = arith.sitofp %42 : vector<16x1xi32> to vector<16x1xf32>
    %44 = tpu.iota {dimensions = array<i32: 1>} : vector<16x2xi32>
    %c0_i32 = arith.constant 0 : i32
    %45 = vector.broadcast %c0_i32 : i32 to vector<16x2xi32>
    %46 = arith.cmpi eq, %44, %45 : vector<16x2xi32>
    %47 = vector.shape_cast %34 : vector<16x1xf32> to vector<16x1xf32>
    %48 = vector.broadcast %47 : vector<16x1xf32> to vector<16x2xf32>
    %49 = vector.shape_cast %43 : vector<16x1xf32> to vector<16x1xf32>
    %50 = vector.broadcast %49 : vector<16x1xf32> to vector<16x2xf32>
    %51 = arith.select %46, %48, %50 : vector<16x2xi1>, vector<16x2xf32>
    %c0_18 = arith.constant 0 : index
    %c0_19 = arith.constant 0 : index
    %52 = vector.load %arg7[%c0_18, %c0_19] : memref<8x16xf32, #tpu.memory_space<vmem>>, vector<8x16xf32>
    %cst_20 = arith.constant dense<0.000000e+00> : vector<8x2xf32>
    %53 = tpu.matmul %52, %51, %cst_20 {dimension_numbers = #tpu.dot_dimension_numbers<[1], [0], [0], [1], [0, 0, 1, 1], [], []>} : vector<8x16xf32>, vector<16x2xf32>, vector<8x2xf32> -> vector<8x2xf32>
    %54 = vector.shape_cast %53 : vector<8x2xf32> to vector<1x8x2xf32>
    %c0_21 = arith.constant 0 : index
    %c0_22 = arith.constant 0 : index
    %c0_23 = arith.constant 0 : index
    %55 = vector.load %arg8[%c0_21, %c0_22, %c0_23] : memref<1x8x2xf32, #tpu.memory_space<vmem>>, vector<1x8x2xf32>
    tpu.vector_store %arg8[%c0_21, %c0_22, %c0_23], %54 {strides = array<i32>} : memref<1x8x2xf32, #tpu.memory_space<vmem>>, vector<1x8x2xf32>,
    return
  }
  func.func @transform_0(%arg0: i32) -> (i32, i32) {
    %c0_i32 = arith.constant 0 : i32
    %c0_i32_0 = arith.constant 0 : i32
    return %arg0, %c0_i32 : i32, i32
  }
  func.func @transform_1(%arg0: i32) -> (i32, i32) {
    %c0_i32 = arith.constant 0 : i32
    %c0_i32_0 = arith.constant 0 : i32
    %c0_i32_1 = arith.constant 0 : i32
    return %c0_i32, %c0_i32_0 : i32, i32
  }
  func.func @transform_2(%arg0: i32) -> (i32, i32) {
    %c0_i32 = arith.constant 0 : i32
    %c0_i32_0 = arith.constant 0 : i32
    %c0_i32_1 = arith.constant 0 : i32
    return %c0_i32, %c0_i32_0 : i32, i32
  }
  func.func @transform_3(%arg0: i32) -> (i32, i32) {
    %c0_i32 = arith.constant 0 : i32
    %c0_i32_0 = arith.constant 0 : i32
    %c0_i32_1 = arith.constant 0 : i32
    return %c0_i32, %c0_i32_0 : i32, i32
  }
  func.func @transform_4(%arg0: i32) -> (i32, i32) {
    %c0_i32 = arith.constant 0 : i32
    %c0_i32_0 = arith.constant 0 : i32
    %c0_i32_1 = arith.constant 0 : i32
    return %c0_i32, %c0_i32_0 : i32, i32
  }
  func.func @transform_5(%arg0: i32) -> (i32, i32) {
    %c0_i32 = arith.constant 0 : i32
    %c0_i32_0 = arith.constant 0 : i32
    return %arg0, %c0_i32 : i32, i32
  }
  func.func @transform_6(%arg0: i32) -> (i32, i32) {
    %c0_i32 = arith.constant 0 : i32
    %c0_i32_0 = arith.constant 0 : i32
    %c0_i32_1 = arith.constant 0 : i32
    return %c0_i32, %c0_i32_0 : i32, i32
  }
  func.func @transform_7(%arg0: i32) -> (i32, i32, i32) {
    %c0_i32 = arith.constant 0 : i32
    %c0_i32_0 = arith.constant 0 : i32
    %c0_i32_1 = arith.constant 0 : i32
    return %arg0, %c0_i32, %c0_i32_0 : i32, i32, i32
  }
}

</mosaic_0001>

<bundles_post_ra>
// kernel: _fused_forward_metrics.1
= control target key start
LH: loop header
LB: loop body
LE: loop exit
PB: predicated region body
PF: predicated region fallthrough
CT: control target
= control target key end

     0   :  { %s731_s24 = smov 0   ;;  %s810_s0 = inlined_call_operand.vmem [shape: bf16[32,32], index: 0, kind: input, shape index: {}]   ;;  %s811_s1 = inlined_call_operand.vmem [shape: bf16[32,64], index: 1, kind: input, shape index: {}]   ;;  %s812_s2 = inlined_call_operand.vmem [shape: f32[1,64], index: 2, kind: input, shape index: {}]   ;;  %s813_s3 = inlined_call_operand.vmem [shape: bf16[64,8], index: 3, kind: input, shape index: {}]   ;;  %s814_s4 = inlined_call_operand.vmem [shape: f32[1,8], index: 4, kind: input, shape index: {}]   ;;  %s815_s5 = inlined_call_operand.vmem [shape: s32[32,1], index: 5, kind: input, shape index: {}]   ;;  %s816_s6 = inlined_call_operand.vmem [shape: f32[8,16], index: 6, kind: input, shape index: {}]   ;;  %s817_s7 = inlined_call_operand.vmem [shape: f32[2,8,2], index: 7, kind: output, shape index: {}]  }
   0x1 LB: > { %s737_s25 = sadd.s32 4294967295, %s687_s24   ;;  %p604_p0 = scmp.ge.s32.totalorder %s687_s24, 1  ;;  %s687_s24 = sphi %s731_s24, %s17_s24  }
   0x2   : > { %p249_p1 = scmp.lt.s32.totalorder %s687_s24, 3 }
   0x4   : > { %p250_p2 = pnand %p604_p0, %p249_p1 }
   0x5   : > { %s605_s28 = sshll.u32 (!%p250_p2), %s737_s25, 1  ;;  %p297_p4 = scmp.lt.s32.totalorder (!%p250_p2), %s737_s25, 1 }
   0x6   : > { %253 = sbr.rel (%p250_p2) target bundleno = 899 (0x383), region = 48  ;;  %p286_p3 = scmp.lt.s32.totalorder (!%p250_p2), %s605_s28, 3 }
   0xb   : > { %v649_v0 = vld [vmem:[%s811_s1 + $0x8] sm:$0xff]  ;;  %v648_v1 = vld [vmem:[%s811_s1] sm:$0xff]  ;;  %s819_s28 = smov (!%p286_p3, %s605_s28), 3  ;;  %vm329_vm0 = vcmask 261120   ;;  %v653_v3 = vld [vmem:[%s813_s3 + $0x18] sm:$0xff]  ;;  %vm386_vm1 = vcmask 523264   ;;  %v431_v22 = vlaneseq }
   0xc   : > { %339 = vmatpush.bf16.msra.mxu0 %v649_v0  ;;  %s606_s8 = sshll.u32 %s819_s28, 2  ;;  %394 = vmatpush.bf16.msra.mxu1 %v653_v3  ;;  %v652_v4 = vld [vmem:[%s813_s3 + $0x10] sm:$0xff]  ;;  %v651_v5 = vld [vmem:[%s813_s3 + $0x8] sm:$0xff]  ;;  %v650_v6 = vld [vmem:[%s813_s3] sm:$0xff]  ;;  %vm406_vm2 = vcmask 64512   ;;  %s608_s26 = sshll.u32 %s819_s28, 3 }
   0xd   : > { %s289_s11 = scalar_lea.vmem %s810_s0, %s606_s8  ;;  %v671_v8 = vld [vmem:[%s812_s2] ss:$0 sm:$0xff]  ;;  %s778_s30 = scalar_lea.vmem %s815_s5, %s608_s26  ;;  %v783_v24 = vand.u32 127, %v431_v22  ;;  %v689_v25 = vmov 0   ;;  %v690_v60 = vmov 0.0   ;;  %vm509_vm12 = vcmask 130048  }
   0xe   : > { %v647_v2 = vld [vmem:[%s289_s11] sm:$0xff]  ;;  %v781_v23 = vld [vmem:[%s778_s30 + $0x8] sm:$0xff]  ;;  %664 = vset.pattern.permute.xlu0 %v689_v25  ;;  %665 = vset.pattern.permute.xlu2 %v689_v25  ;;  %s821_s25 = smov (!%p297_p4, %s737_s25), 1  ;;  %vm533_vm13 = vcmask 15360  }
   0xf   : > { %v672_v16 = vld [vmem:[%s814_s4] ss:$0 sm:$0xff]  ;;  %vm495_vm11 = vcmp.eq.s32.totalorder %v783_v24, 0  ;;  %s609_s9 = sshll.u32 %s821_s25, 3 }
  0x10   : > { %340 = vmatpush.bf16.msra.mxu0 %v648_v1  ;;  %395 = vmatpush.bf16.msra.mxu1 %v652_v4  ;;  %v404_v44 = vld [vmem:[%s778_s30] sm:$0xff]  ;;  %s300_s12 = scalar_lea.vmem %s817_s7, %s609_s9 }
  0x13   : > { %622 = vmatmul.msk.bf16.vlgmr.msra.gmra.mxu0 %vm329_vm0, %v647_v2 }
  0x14   : > { %396 = vmatpush.bf16.msra.mxu1 %v651_v5 }
  0x18   : > { %397 = vmatpush.bf16.msra.mxu1 %v650_v6 }
  0x90   : > { %v342_v7 = vpop.f32.mrf.mxu0 }
  0x91   : > { %v343_v9 = vadd.f32 %v671_v8, %v342_v7 }
  0x93   : > { %v347_v12 = vmax.f32 %v343_v9, 0.0 }
  0x98   : > { %v344_v10 = vpop.f32.mrf.mxu0 }
  0x99   : > { %v345_v11 = vadd.f32 %v671_v8, %v344_v10 }
  0x9b   : > { %v348_v13 = vmax.f32 %v345_v11, 0.0 }
  0x9d   : > { %v349_v14 = vpack.c.bf16 %v348_v13, %v347_v12 }
  0x9f   : > { %639 = vmatmul.msk.bf16.vlgmr.msra.gmra.mxu1 %vm386_vm1, %v349_v14 }
 0x11c   : > { %v399_v15 = vpop.f32.mrf.mxu1 }
 0x11d   : > { %v400_v20 = vadd.f32 %v672_v16, %v399_v15 }
 0x11f   : > { %v407_v21 = vsel %vm406_vm2, %v400_v20, -inf }
 0x124   : > { %v401_v17 = vpop.f32.mrf.mxu1 }
 0x125   : > { %v402_v18 = vadd.f32 %v672_v16, %v401_v17 }
 0x127   : > { %v410_v19 = vsel %vm406_vm2, %v402_v18, -inf }
 0x128   : > { %411 = vmax.xlane.f32.xlu0 %v410_v19 }
 0x130   : > { %408 = vmax.xlane.f32.xlu0 %v407_v21 }
 0x144   : > { %437 = vperm.xlu0 %664, %v781_v23  }
 0x19b   : > { %v412_v26 = vpop.xlane.xlu0 %411 }
 0x19c   : > { %vm456_vm3 = vcmp.eq.f32.partialorder %v402_v18, %v412_v26  ;;  %v414_v34 = vsub.f32 %v402_v18, %v412_v26 }
 0x19d   : > { %v458_v27 = vsel %vm456_vm3, %v783_v24, 8 }
 0x19e   : > { %v474_v28 = vsel %vm406_vm2, %v458_v27, 2147483647  ;;  %v417_v39 = vmul.f32 1.442695, %v414_v34 }
 0x19f   : > { %v476_v29 = vshra.s32 %v474_v28, 16  ;;  %v475_v45 = vand.u32 65535, %v474_v28 }
 0x1a1   : > { %v478_v30 = vcvt.s32.f32 %v476_v29  ;;  %v477_v47 = vcvt.s32.f32 %v475_v45 }
 0x1a3   : > { %479 = vmin.xlane.f32.xlu1 %v478_v30  ;;  %v409_v31 = vpop.xlane.xlu0 %408 }
 0x1a4   : > { %v413_v32 = vsub.f32 %v400_v20, %v409_v31  ;;  %vm455_vm4 = vcmp.eq.f32.partialorder %v400_v20, %v409_v31 }
 0x1a5   : > { %v457_v33 = vsel %vm455_vm4, %v783_v24, 8 }
 0x1a6   : > { %v415_v35 = vmul.f32 1.442695, %v413_v32  ;;  %v459_v36 = vsel %vm406_vm2, %v457_v33, 2147483647 }
 0x1a7   : > { %v461_v37 = vshra.s32 %v459_v36, 16  ;;  %v460_v49 = vand.u32 65535, %v459_v36 }
 0x1a8   : > { %673 = vpow2.f32 %v415_v35 }
 0x1a9   : > { %v463_v38 = vcvt.s32.f32 %v461_v37  ;;  %675 = vpow2.f32 %v417_v39  ;;  %v462_v51 = vcvt.s32.f32 %v460_v49 }
 0x1ab   : > { %464 = vmin.xlane.f32.xlu1 %v463_v38 }
 0x1ae   : > { %v674_v40 = vpop.eup %673 }
 0x1af   : > { %v419_v41 = vsel %vm406_vm2, %v674_v40, 0.0  ;;  %v676_v42 = vpop.eup %675 }
 0x1b0   : > { %420 = vadd.xlane.f32.xlu2 %v419_v41  ;;  %v422_v43 = vsel %vm406_vm2, %v676_v42, 0.0 }
 0x1b6   : > { %v438_v55 = vpop.permute.xlu0 %437 }
 0x1b7   : > { %vm440_vm7 = vcmp.eq.s32.totalorder %v783_v24, %v438_v55 }
 0x1b8   : > { %423 = vadd.xlane.f32.xlu2 %v422_v43  ;;  %v641_v61 = vsel %vm440_vm7, 1.0, %v690_v60 }
 0x1d0   : > { %434 = vperm.xlu2 %665, %v404_v44  }
 0x216   : > { %v480_v46 = vpop.xlane.xlu1 %479 }
 0x217   : > { %vm481_vm5 = vcmp.eq.f32.partialorder %v478_v30, %v480_v46  ;;  %v486_v7 = vcvt.f32.s32 %v480_v46 }
 0x218   : > { %v482_v48 = vsel %vm481_vm5, %v477_v47, inf }
 0x219   : > { %483 = vmin.xlane.f32.xlu1 %v482_v48  ;;  %v487_v9 = vshll.u32 %v486_v7, 16 }
 0x21e   : > { %v465_v50 = vpop.xlane.xlu1 %464 }
 0x21f   : > { %vm466_vm6 = vcmp.eq.f32.partialorder %v463_v38, %v465_v50  ;;  %v471_v10 = vcvt.f32.s32 %v465_v50 }
 0x220   : > { %v467_v52 = vsel %vm466_vm6, %v462_v51, inf }
 0x221   : > { %468 = vmin.xlane.f32.xlu1 %v467_v52  ;;  %v472_v13 = vshll.u32 %v471_v10, 16 }
 0x223   : > { %v421_v53 = vpop.xlane.xlu2 %420 }
 0x22b   : > { %v424_v54 = vpop.xlane.xlu2 %423 }
 0x22c   : > { %677 = vlog2.f32 %v424_v54 }
 0x22d   : > { %679 = vlog2.f32 %v421_v53 }
 0x232   : > { %v678_v56 = vpop.eup %677 }
 0x233   : > { %v428_v57 = vmul.f32 0.6931472, %v678_v56  ;;  %v680_v58 = vpop.eup %679  ;;  %v435_v59 = vpop.permute.xlu2 %434 }
 0x234   : > { %v426_v63 = vmul.f32 0.6931472, %v680_v58  ;;  %vm439_vm8 = vcmp.eq.s32.totalorder %v783_v24, %v435_v59 }
 0x235   : > { %v430_v62 = vsub.f32 %v414_v34, %v428_v57  ;;  %v640_v2 = vsel %vm439_vm8, 1.0, %v690_v60 }
 0x236   : > { %v429_v3 = vsub.f32 %v413_v32, %v426_v63 }
 0x237   : > { %v446_v0 = vmul.f32 %v641_v61, %v430_v62 }
 0x238   : > { %v445_v4 = vmul.f32 %v640_v2, %v429_v3 }
 0x239   : > { %v450_v1 = vsel %vm406_vm2, %v446_v0, 0.0 }
 0x23a   : > { %451 = vadd.xlane.f32.xlu1 %v450_v1  ;;  %v447_v5 = vsel %vm406_vm2, %v445_v4, 0.0 }
 0x242   : > { %448 = vadd.xlane.f32.xlu1 %v447_v5 }
 0x28c   : > { %v484_v6 = vpop.xlane.xlu1 %483 }
 0x28d   : > { %v485_v8 = vcvt.f32.s32 %v484_v6 }
 0x28f   : > { %v488_v11 = vadd.s32 %v487_v9, %v485_v8 }
 0x291   : > { %vm490_vm9 = vcmp.eq.s32.totalorder %v488_v11, %v781_v23  ;;  %v508_v23 = vld [vmem:[%s816_s6] sm:$0xff] }
 0x292   : > { %v643_v17 = vsel %vm490_vm9, 1.0, %v690_v60 }
 0x294   : > { %v469_v12 = vpop.xlane.xlu1 %468 }
 0x295   : > { %v470_v14 = vcvt.f32.s32 %v469_v12 }
 0x297   : > { %v473_v15 = vadd.s32 %v472_v13, %v470_v14 }
 0x299   : > { %vm489_vm10 = vcmp.eq.s32.totalorder %v473_v15, %v404_v44 }
 0x29a   : > { %v642_v16 = vsel %vm489_vm10, 1.0, %v690_v60 }
 0x29b   : > { %v666_v18 = vpack.i.bf16 %v642_v16, %v643_v17 }
 0x29d   : > { %667 = vperm.xlu2 %665, %v666_v18  }
 0x2ad   : > { %v452_v19 = vpop.xlane.xlu1 %451 }
 0x2ae   : > { %v454_v22 = vsub.f32 0.0, %v452_v19 }
 0x2b5   : > { %v449_v20 = vpop.xlane.xlu1 %448 }
 0x2b6   : > { %v453_v27 = vsub.f32 0.0, %v449_v20 }
 0x2f7   : > { %v668_v21 = vpop.permute.xlu2 %667 }
 0x2f8   : > { %v670_v25 = vunpack.i.h.bf16 %v668_v21  ;;  %v669_v26 = vunpack.i.l.bf16 %v668_v21 }
 0x2fa   : > { %v507_v28 = vsel %vm495_vm11, %v454_v22, %v669_v26  ;;  %v506_v29 = vsel %vm495_vm11, %v453_v27, %v670_v25 }
 0x2fb   : > { %527 = vmatpush.msra.mxu2 %v507_v28 }
 0x2fd   : > { %528 = vmatpush.msra.mxu2 %v506_v29 }
 0x2fe   : > { %644 = vmatmul.msk.f32.vlgmr.msra.gmra.mxu2 %vm509_vm12, %v508_v23 }
 0x381   : > { %v530_v24 = vpop.f32.mrf.mxu2 }
 0x382   : > { %534 = vst.msk [vmem:[%s300_s12] sm:$0xff] %vm533_vm13, %v530_v24 }
 0x383 PF: > { %s17_s24 = sadd.s32 1, %s687_s24  }
 0x384   : > { %p14_p5 = scmp.ge.s32.totalorder %s17_s24, 4  }
 0x386   :  { %16 = sbr.rel (!%p14_p5) target bundleno = 1 (0x1), region = 81 }

</bundles_post_ra>
